<compile_context>
chip_gen: v7x
topology: tpu7x:2x2x1
jax: 0.10.0
libtpu: 0.0.40
codegen_flags: <defaults>
</compile_context>

<pallas_src>
import math
import functools

import jax
import jax.numpy as jnp
from jax import lax
from jax.experimental import pallas as pl
from jax.experimental.pallas import tpu as pltpu


# -----------------------------------------------------------------------------
# Parameter / buffer construction (plain JAX glue, mirrors nn.Module.__init__)
# -----------------------------------------------------------------------------
def make_sinusoidal_pe(max_len: int, embed_dim: int) -> jnp.ndarray:
    """Reproduces the PyTorch buffer `pe` of shape (1, max_len, embed_dim)."""
    position = jnp.arange(0, max_len, dtype=jnp.float32)[:, None]            # (L, 1)
    div_term = jnp.exp(
        jnp.arange(0, embed_dim, 2, dtype=jnp.float32)
        * (-math.log(10000.0) / embed_dim)
    )
    pe = jnp.zeros((max_len, embed_dim), dtype=jnp.float32)
    pe = pe.at[:, 0::2].set(jnp.sin(position * div_term))
    if embed_dim % 2 == 1:
        pe = pe.at[:, 1::2].set(jnp.cos(position * div_term[:-1]))
    else:
        pe = pe.at[:, 1::2].set(jnp.cos(position * div_term))
    return pe[None]                                                           # (1, L, D)


def make_learnable_pe(key, max_len: int, embed_dim: int) -> jnp.ndarray:
    """Stand-in for nn.Parameter(torch.randn(1, L, D) * 0.02)."""
    return jax.random.normal(key, (1, max_len, embed_dim), dtype=jnp.float32) * 0.02


# -----------------------------------------------------------------------------
# Tile-size helpers (budgeted so 2x(x) + 2x(out) + 2x(pe) buffers stay well
# under v5e's 16 MiB default scoped-VMEM limit; also fine on v6e/v7x)
# -----------------------------------------------------------------------------
_TARGET_BLOCK_BYTES = 2 * 1024 * 1024


def _choose_seq_tile(seq_len: int, embed_dim: int, itemsize: int) -> int:
    rows = _TARGET_BLOCK_BYTES // max(1, embed_dim * itemsize)
    rows = max(8, (rows // 8) * 8)          # multiple of 8 (sublane constraint)
    return seq_len if rows >= seq_len else rows


def _choose_flat_tile(batch: int, n_flat: int, itemsize: int) -> int:
    lanes = _TARGET_BLOCK_BYTES // max(1, batch * itemsize)
    lanes = max(128, (lanes // 128) * 128)  # multiple of 128 (lane constraint)
    return n_flat if lanes >= n_flat else lanes


# -----------------------------------------------------------------------------
# In-kernel stateless hash PRNG (int32 only; lowers on Mosaic and in interpret)
# -----------------------------------------------------------------------------
def _lshr(x, k: int):
    # logical right shift for int32: arithmetic shift then clear sign-extended bits
    mask = jnp.int32((1 << (32 - k)) - 1)
    return jnp.bitwise_and(jnp.right_shift(x, k), mask)


def _mix32(x):
    # splitmix32-style finalizer (wrapping int32 arithmetic)
    x = jnp.bitwise_xor(x, _lshr(x, 16))
    x = x * jnp.int32(2146120749)           # 0x7FEB352D
    x = jnp.bitwise_xor(x, _lshr(x, 15))
    x = x * jnp.int32(-2073254261)          # 0x846CA68B
    x = jnp.bitwise_xor(x, _lshr(x, 16))
    return x


def _keep_mask(linear_idx, seed, rate: float):
    # Bernoulli(keep = 1 - rate) mask, threshold done in the integer domain.
    h = _mix32(linear_idx + seed * jnp.int32(-1640531527))   # 0x9E3779B9
    r = jnp.bitwise_and(h, jnp.int32(0x7FFFFFFF))            # uniform in [0, 2^31)
    thresh = jnp.int32(min(int(rate * float(1 << 31)), (1 << 31) - 1))
    return r >= thresh


# -----------------------------------------------------------------------------
# Pallas kernels
# -----------------------------------------------------------------------------
def _add_kernel(x_ref, pe_ref, o_ref):
    # Eval-mode forward: out = x + pe (dropout is identity in eval).
    # Works for both layouts: (1,TS,D)+(1,TS,D) and (B,TN)+(1,TN) via broadcast.
    o_ref[...] = x_ref[...] + pe_ref[...]


def _add_dropout_kernel_3d(seed_ref, x_ref, pe_ref, o_ref, *,
                           rate: float, seq_len: int, embed_dim: int, ts: int):
    # Training-mode forward, 3-D layout. Block = (1, ts, embed_dim).
    s = pl.program_id(0)
    b = pl.program_id(1)
    y = x_ref[...] + pe_ref[...]
    blk = y.shape
    row = lax.broadcasted_iota(jnp.int32, blk, 1)
    col = lax.broadcasted_iota(jnp.int32, blk, 2)
    g_row = s * ts + row
    linear = (b * seq_len + g_row) * embed_dim + col          # global element id
    keep = _keep_mask(linear, seed_ref[0], rate)
    scale = jnp.asarray(1.0 / (1.0 - rate), dtype=y.dtype)
    o_ref[...] = jnp.where(keep, y * scale, jnp.zeros_like(y))


def _add_dropout_kernel_flat(seed_ref, x_ref, pe_ref, o_ref, *,
                             rate: float, n_flat: int, tn: int):
    # Training-mode forward, lane-dense flattened layout. Block = (B, tn).
    t = pl.program_id(0)
    y = x_ref[...] + pe_ref[...]
    blk = y.shape
    brow = lax.broadcasted_iota(jnp.int32, blk, 0)
    col = lax.broadcasted_iota(jnp.int32, blk, 1)
    linear = brow * n_flat + (t * tn + col)                   # global element id
    keep = _keep_mask(linear, seed_ref[0], rate)
    scale = jnp.asarray(1.0 / (1.0 - rate), dtype=y.dtype)
    o_ref[...] = jnp.where(keep, y * scale, jnp.zeros_like(y))


# -----------------------------------------------------------------------------
# Forward wrapper (the nn.Module.forward equivalent)
# -----------------------------------------------------------------------------
def _forward_3d(x, pe, *, dropout_rate, apply_dropout, seed):
    B, S, D = x.shape
    itemsize = x.dtype.itemsize
    TS = _choose_seq_tile(S, D, itemsize)
    grid = (pl.cdiv(S, TS), B)                       # batch innermost -> PE resident
    out_shape = jax.ShapeDtypeStruct((B, S, D), x.dtype)
    cost = pl.CostEstimate(flops=B * S * D, transcendentals=0,
                           bytes_accessed=(2 * B * S * D + S * D) * itemsize)
    cparams = pltpu.CompilerParams(dimension_semantics=("parallel", "parallel"))

    if not apply_dropout:
        return pl.pallas_call(
            _add_kernel,
            out_shape=out_shape,
            grid_spec=pltpu.PrefetchScalarGridSpec(
                num_scalar_prefetch=0,
                grid=grid,
                in_specs=[pl.BlockSpec((1, TS, D), lambda s, b: (b, s, 0)),
                          pl.BlockSpec((1, TS, D), lambda s, b: (0, s, 0))],
                out_specs=pl.BlockSpec((1, TS, D), lambda s, b: (b, s, 0)),
            ),
            compiler_params=cparams,
            cost_estimate=cost,
        )(x, pe)                                     # full PE table; no XLA slice

    seed_arr = jnp.asarray([seed], dtype=jnp.int32)
    kernel = functools.partial(_add_dropout_kernel_3d, rate=float(dropout_rate),
                               seq_len=S, embed_dim=D, ts=TS)
    return pl.pallas_call(
        kernel,
        out_shape=out_shape,
        grid_spec=pltpu.PrefetchScalarGridSpec(
            num_scalar_prefetch=1,                   # seed lives in SMEM
            grid=grid,
            in_specs=[pl.BlockSpec((1, TS, D), lambda s, b, sd: (b, s, 0)),
                      pl.BlockSpec((1, TS, D), lambda s, b, sd: (0, s, 0))],
            out_specs=pl.BlockSpec((1, TS, D), lambda s, b, sd: (b, s, 0)),
        ),
        compiler_params=cparams,
        cost_estimate=cost,
    )(seed_arr, x, pe)


def _forward_flat(x, pe, *, dropout_rate, apply_dropout, seed):
    B, S, D = x.shape
    N = S * D
    itemsize = x.dtype.itemsize
    x2 = x.reshape(B, N)                             # free reshape (contiguous)
    pe2 = pe[:, :S, :].reshape(1, N)                 # lane-dense PE slab
    TN = _choose_flat_tile(B, N, itemsize)
    grid = (pl.cdiv(N, TN),)
    out_shape = jax.ShapeDtypeStruct((B, N), x.dtype)
    cost = pl.CostEstimate(flops=B * N, transcendentals=0,
                           bytes_accessed=(2 * B * N + N) * itemsize)
    cparams = pltpu.CompilerParams(dimension_semantics=("parallel",))

    if not apply_dropout:
        out = pl.pallas_call(
            _add_kernel,
            out_shape=out_shape,
            grid_spec=pltpu.PrefetchScalarGridSpec(
                num_scalar_prefetch=0,
                grid=grid,
                in_specs=[pl.BlockSpec((B, TN), lambda t: (0, t)),
                          pl.BlockSpec((1, TN), lambda t: (0, t))],
                out_specs=pl.BlockSpec((B, TN), lambda t: (0, t)),
            ),
            compiler_params=cparams,
            cost_estimate=cost,
        )(x2, pe2)
        return out.reshape(B, S, D)

    seed_arr = jnp.asarray([seed], dtype=jnp.int32)
    kernel = functools.partial(_add_dropout_kernel_flat, rate=float(dropout_rate),
                               n_flat=N, tn=TN)
    out = pl.pallas_call(
        kernel,
        out_shape=out_shape,
        grid_spec=pltpu.PrefetchScalarGridSpec(
            num_scalar_prefetch=1,                   # seed lives in SMEM
            grid=grid,
            in_specs=[pl.BlockSpec((B, TN), lambda t, sd: (0, t)),
                      pl.BlockSpec((1, TN), lambda t, sd: (0, t))],
            out_specs=pl.BlockSpec((B, TN), lambda t, sd: (0, t)),
        ),
        compiler_params=cparams,
        cost_estimate=cost,
    )(seed_arr, x2, pe2)
    return out.reshape(B, S, D)


def positional_encoding_forward(x, pe, *, dropout_rate=0.1, training=False, seed=0):
    """
    x  : (B, S, D)
    pe : (1, max_len, D)  (sinusoidal buffer or learnable parameter)
    Returns (B, S, D): dropout(x + pe[:, :S, :])
    """
    _, _, D = x.shape
    apply_dropout = bool(training) and dropout_rate > 0.0
    if D % 128 == 0:
        return _forward_3d(x, pe, dropout_rate=dropout_rate,
                           apply_dropout=apply_dropout, seed=seed)
    # D not lane-aligned: flatten (S, D) so stores are lane-dense.
    return _forward_flat(x, pe, dropout_rate=dropout_rate,
                         apply_dropout=apply_dropout, seed=seed)


# -----------------------------------------------------------------------------
# Test
# -----------------------------------------------------------------------------
if __name__ == "__main__":
    key = jax.random.PRNGKey(0)
    kx, kx2 = jax.random.split(key)

    # ---- Case 1: small embed dim (D % 128 != 0) -> lane-dense flattened path.
    B, S, D = 2, 8, 32
    max_len = 64
    x = jax.random.normal(kx, (B, S, D), dtype=jnp.float32)
    pe = make_sinusoidal_pe(max_len, D)

    out = positional_encoding_forward(x, pe, dropout_rate=0.1, training=False)
    out = jax.block_until_ready(out)
    ref = x + pe[:, :S, :]
    assert out.shape == (B, S, D)
    assert jnp.allclose(out, ref, atol=1e-6, rtol=1e-6)

    # ---- Case 2: D multiple of 128 -> 3-D tiled path (PE resident across batch).
    B2, S2, D2 = 2, 16, 128
    x2 = jax.random.normal(kx2, (B2, S2, D2), dtype=jnp.float32)
    pe2 = make_sinusoidal_pe(max_len, D2)
    out2 = positional_encoding_forward(x2, pe2, dropout_rate=0.1, training=False)
    out2 = jax.block_until_ready(out2)
    ref2 = x2 + pe2[:, :S2, :]
    assert out2.shape == (B2, S2, D2)
    assert jnp.allclose(out2, ref2, atol=1e-6, rtol=1e-6)

    # ---- Training mode (stochastic inverted dropout) on both paths.
    p = 0.1
    out_t = positional_encoding_forward(x, pe, dropout_rate=p, training=True, seed=42)
    out_t = jax.block_until_ready(out_t)
    assert out_t.shape == (B, S, D)
    kept = out_t != 0.0
    # surviving elements must equal ref / (1 - p) exactly; dropped ones are 0
    assert jnp.allclose(jnp.where(kept, out_t, 0.0),
                        jnp.where(kept, ref / (1.0 - p), 0.0),
                        atol=1e-5, rtol=1e-5)

    out2_t = positional_encoding_forward(x2, pe2, dropout_rate=p, training=True, seed=7)
    out2_t = jax.block_until_ready(out2_t)
    assert out2_t.shape == (B2, S2, D2)

    print("KERNEL_OK")
</pallas_src>

<mosaic_0001>
module attributes {stable_mosaic.version = 11 : i64} {
  func.func @_add_kernel(%arg0: i32, %arg1: memref<2x256xf32, #tpu.memory_space<vmem>>, %arg2: memref<1x256xf32, #tpu.memory_space<vmem>>, %arg3: memref<2x256xf32, #tpu.memory_space<vmem>>) attributes {dimension_semantics = [#tpu.dimension_semantics<parallel>], iteration_bounds = array<i64: 1>, scalar_prefetch = 0 : i64, scratch_operands = 0 : i64, tpu.core_type = #tpu.core_type<tc>, window_params = [{transform_indices = @transform_0, window_bounds = array<i64: 2, 256>}, {transform_indices = @transform_1, window_bounds = array<i64: 1, 256>}, {transform_indices = @transform_2, window_bounds = array<i64: 2, 256>}]} {
    %c0 = arith.constant 0 : index
    %c0_0 = arith.constant 0 : index
    %0 = vector.load %arg1[%c0, %c0_0] : memref<2x256xf32, #tpu.memory_space<vmem>>, vector<2x256xf32>
    %c0_1 = arith.constant 0 : index
    %c0_2 = arith.constant 0 : index
    %1 = vector.load %arg2[%c0_1, %c0_2] : memref<1x256xf32, #tpu.memory_space<vmem>>, vector<1x256xf32>
    %2 = vector.broadcast %1 : vector<1x256xf32> to vector<2x256xf32>
    %3 = arith.addf %0, %2 : vector<2x256xf32>
    %c0_3 = arith.constant 0 : index
    %c0_4 = arith.constant 0 : index
    %4 = vector.load %arg3[%c0_3, %c0_4] : memref<2x256xf32, #tpu.memory_space<vmem>>, vector<2x256xf32>
    tpu.vector_store %arg3[%c0_3, %c0_4], %3 {strides = array<i32>} : memref<2x256xf32, #tpu.memory_space<vmem>>, vector<2x256xf32>,
    return
  }
  func.func @transform_0(%arg0: i32) -> (i32, i32) {
    %c0_i32 = arith.constant 0 : i32
    %c0_i32_0 = arith.constant 0 : i32
    return %c0_i32, %arg0 : i32, i32
  }
  func.func @transform_1(%arg0: i32) -> (i32, i32) {
    %c0_i32 = arith.constant 0 : i32
    %c0_i32_0 = arith.constant 0 : i32
    return %c0_i32, %arg0 : i32, i32
  }
  func.func @transform_2(%arg0: i32) -> (i32, i32) {
    %c0_i32 = arith.constant 0 : i32
    %c0_i32_0 = arith.constant 0 : i32
    return %c0_i32, %arg0 : i32, i32
  }
}

</mosaic_0001>

<bundles_post_ra>
// kernel: tpu_custom_call.1
= control target key start
LH: loop header
LB: loop body
LE: loop exit
PB: predicated region body
PF: predicated region fallthrough
CT: control target
= control target key end

     0   :  { %7 = vsyncpa [#allocation3], 0  ;;  %s157_s0 = inlined_call_operand.hbm [shape: f32[2,256], index: 0, kind: input, shape index: {}]   ;;  %s158_s1 = inlined_call_operand.vmem [shape: f32[1,256], index: 1, kind: input, shape index: {}]   ;;  %s159_s2 = inlined_call_operand.hbm [shape: f32[2,256], index: 2, kind: output, shape index: {}]  }
   0x1   :  { %8 = vsyncpa [#allocation4], 0  ;;  %s112_s9 = smov [#allocation2]   ;;  %s64_s13 = scalar_lea.hbm %s157_s0, 64 }
   0x2   :  { %s15_s10 = sshll.u32 %s112_s9, 4  ;;  %p65_p0 = scmp.ne.s32.totalorder %s157_s0, %s64_s13  ;;  %s16_s10 = int_to_ptr.vmem [resolvable:$true] %s15_s10 }
   0x3   :  { %p68_p1 = scmp.lt.u32.totalorder %s64_s13, %s157_s0 }
   0x5   :  { %p70_p2 = pnand %p68_p1, %p65_p0 }
   0x7   :  { %73 = shalt.err (!%p70_p2)
}
   0x8   :  { %s74_s18 = scalar_lea.vmem %s16_s10, 64  ;;  %p79_p4 = scmp.lt.s32.totalorder %s16_s10, %s16_s10 }
   0x9   :  { %p75_p3 = scmp.ne.s32.totalorder %s16_s10, %s74_s18  ;;  %p80_p5 = scmp.lt.s32.totalorder %s74_s18, %s74_s18 }
   0xb   :  { %p81_p6 = por %p80_p5, %p79_p4 }
   0xd   :  { %p82_p7 = pnand %p81_p6, %p75_p3 }
   0xf   :  { %85 = shalt.err (!%p82_p7)
}
  0x10   :  { %18 = dma.hbm_to_vmem [thread:$0]  %s157_s0, 64, %s16_s10, [#allocation3]  }
  0x11   :  { %108 = dma.done.wait [#allocation3], 64  }
  0x12   :  { %109 = vsyncadd [#allocation3], 4294967232  ;;  %v27_v0 = vlaneseq  ;;  %v113_v1 = vmov 1983009808   ;;  %v25_v7 = vld [vmem:[%s158_s1] sm:$0x3] }
  0x13   :  { %v37_v2 = vunpack.c.l.s4 %v113_v1  ;;  %v24_v12 = vld [vmem:[#allocation2] sm:$0xf]  ;;  %s114_s23 = smov [#allocation5]  }
  0x14   :  { %v28_v3 = vshrl.u32 %v27_v0, 7  ;;  %s52_s0 = sshll.u32 %s114_s23, 4  ;;  %s53_s0 = int_to_ptr.vmem [resolvable:$true] %s52_s0 }
  0x15   :  { %v38_v6 = vunpack.c.0.s8 %v37_v2  ;;  %s86_s24 = scalar_lea.vmem %s53_s0, 64  ;;  %p91_p9 = scmp.lt.s32.totalorder %s53_s0, %s53_s0 }
  0x16   :  { %v29_v4 = vsub.s32 0, %v28_v3  ;;  %v33_v5 = vsub.s32 1, %v28_v3  ;;  %p87_p8 = scmp.ne.s32.totalorder %s53_s0, %s86_s24  ;;  %p92_p10 = scmp.lt.s32.totalorder %s86_s24, %s86_s24 }
  0x17   :  { %v41_v10 = vsub.s32 %v38_v6, %v28_v3 }
  0x18   :  { %v30_v8 = vrot.slane %v25_v7, %v29_v4  ;;  %v34_v9 = vrot.slane %v25_v7, %v33_v5  ;;  %p93_p11 = por %p92_p10, %p91_p9 }
  0x1a   :  { %v35_v11 = vcombine.low %v30_v8, %v34_v9  ;;  %p94_p12 = pnand %p93_p11, %p87_p8 }
  0x1c   :  { %v42_v13 = vrot.slane %v35_v11, %v41_v10 }
  0x1e   :  { %v44_v14 = vadd.f32 %v42_v13, %v24_v12 }
  0x20   :  { %45 = vst [vmem:[#allocation5] sm:$0xf] %v44_v14 }
  0x21   :  { %97 = shalt.err (!%p94_p12)
}
  0x22   :  { %s98_s26 = scalar_lea.hbm %s159_s2, 64 }
  0x23   :  { %p99_p13 = scmp.ne.s32.totalorder %s159_s2, %s98_s26  ;;  %p102_p0 = scmp.lt.u32.totalorder %s98_s26, %s159_s2 }
  0x25   :  { %p104_p1 = pnand %p102_p0, %p99_p13 }
  0x27   :  { %107 = shalt.err (!%p104_p1)
}
  0x28   :  { %55 = dma.vmem_to_hbm [thread:$0]  %s53_s0, 64, %s159_s2, [#allocation4]  }
  0x29   :  { %110 = dma.done.wait [#allocation4], 64  }
  0x2a   :  { %111 = vsyncadd [#allocation4], 4294967232 }
  0x2b   :  { %59 = vsyncpa [#allocation3], 1 }
  0x2c   :  { %60 = vsyncpa [#allocation4], 1 }

</bundles_post_ra>
